<compile_context>
chip_gen: v5e
topology: v5e:2x2
jax: 0.10.0
libtpu: 0.0.40
codegen_flags: <defaults>
</compile_context>

<pallas_src>
import jax
import jax.numpy as jnp
from jax.experimental import pallas as pl
from jax.experimental.pallas import tpu as pltpu

FEAT_PAD = 128      # lane-dense feature width
BATCH_TILE = 128    # rows per grid step


def mlp_kernel(x_ref, w_ref, b_ref, o_ref):
    # x_ref: (BT, F) bf16
    # w_ref: (L, F, F) bf16   -- all 5 layer weights, (in, out) layout, padded
    # b_ref: (L, 1, F) f32    -- all 5 biases, padded
    # o_ref: (BT, F) f32
    h = x_ref[...]                       # bf16 activations
    n_layers = w_ref.shape[0]            # static (5)
    for l in range(n_layers):
        y = jnp.dot(h, w_ref[l], preferred_element_type=jnp.float32)
        y = y + b_ref[l]                 # (1, F) f32 broadcast over batch
        if l < n_layers - 1:
            h = jnp.maximum(y, 0.0).astype(jnp.bfloat16)   # ReLU, back to bf16
        else:
            o_ref[...] = y.astype(o_ref.dtype)             # final layer: no ReLU


def regularization_traj_nn(x, w_stack, b_stack, out_dim):
    """x: (B, in_dim) f32. w_stack: (L, F, F) bf16. b_stack: (L, 1, F) f32."""
    B, in_dim = x.shape
    L, F, _ = w_stack.shape

    # Pad batch to a full tile and features to the lane-dense width.
    n_tiles = pl.cdiv(B, BATCH_TILE)
    b_pad = n_tiles * BATCH_TILE
    x_pad = jnp.zeros((b_pad, F), jnp.bfloat16)
    x_pad = x_pad.at[:B, :in_dim].set(x.astype(jnp.bfloat16))

    out_pad = pl.pallas_call(
        mlp_kernel,
        out_shape=jax.ShapeDtypeStruct((b_pad, F), jnp.float32),
        grid=(n_tiles,),
        in_specs=[
            pl.BlockSpec((BATCH_TILE, F), lambda i: (i, 0)),   # batch-tiled x
            pl.BlockSpec((L, F, F), lambda i: (0, 0, 0)),      # weights resident
            pl.BlockSpec((L, 1, F), lambda i: (0, 0, 0)),      # biases resident
        ],
        out_specs=pl.BlockSpec((BATCH_TILE, F), lambda i: (i, 0)),
        compiler_params=pltpu.CompilerParams(
            dimension_semantics=("parallel",)),
    )(x_pad, w_stack, b_stack)

    return out_pad[:B, :out_dim]


def init_params(key, dims):
    """Mimics nn.Linear default init (uniform +/- 1/sqrt(fan_in)).

    Returns [(W, b)] with W in (in, out) layout (PyTorch weight transposed),
    b as (out,) vectors. dims = (in_dim, h1, h2, h3, h4, out_dim) -> 5 layers.
    """
    params = []
    for i in range(len(dims) - 1):
        fan_in, fan_out = dims[i], dims[i + 1]
        key, kw, kb = jax.random.split(key, 3)
        bound = 1.0 / (fan_in ** 0.5)
        w = jax.random.uniform(kw, (fan_in, fan_out), jnp.float32, -bound, bound)
        b = jax.random.uniform(kb, (fan_out,), jnp.float32, -bound, bound)
        params.append((w, b))
    return params


def pack_params(params, feat_pad=FEAT_PAD):
    """Zero-pad every layer to (feat_pad, feat_pad) and stack into single buffers."""
    L = len(params)
    w_stack = jnp.zeros((L, feat_pad, feat_pad), jnp.bfloat16)
    b_stack = jnp.zeros((L, 1, feat_pad), jnp.float32)
    for l, (w, b) in enumerate(params):
        fi, fo = w.shape
        w_stack = w_stack.at[l, :fi, :fo].set(w.astype(jnp.bfloat16))
        b_stack = b_stack.at[l, 0, :fo].set(b)
    return w_stack, b_stack


def reference_forward(x, params):
    """Pure-JAX reference with matching numerics (bf16 operands, f32 accumulate)."""
    h = x
    n = len(params)
    for i, (w, b) in enumerate(params):
        y = jnp.dot(h.astype(jnp.bfloat16), w.astype(jnp.bfloat16),
                    preferred_element_type=jnp.float32) + b
        h = jnp.maximum(y, 0.0) if i < n - 1 else y
    return h


if __name__ == "__main__":
    # in_dim, h1, h2, h3, h4, out_dim  (5 linear layers, ReLU after first 4)
    dims = (16, 32, 64, 64, 32, 8)
    batch = 8

    key = jax.random.PRNGKey(0)
    key, kx = jax.random.split(key)
    x = jax.random.normal(kx, (batch, dims[0]), jnp.float32)

    params = init_params(key, dims)
    w_stack, b_stack = pack_params(params)

    out = regularization_traj_nn(x, w_stack, b_stack, out_dim=dims[-1])
    out = jax.block_until_ready(out)

    ref = reference_forward(x, params)
    assert out.shape == (batch, dims[-1]), f"bad shape {out.shape}"
    assert jnp.allclose(out, ref, atol=2e-2, rtol=2e-2), "mismatch vs JAX reference"

    print("KERNEL_OK")
</pallas_src>

<mosaic_0001>
module attributes {stable_mosaic.version = 11 : i64} {
  func.func @mlp_kernel(%arg0: i32, %arg1: memref<128x128xbf16, #tpu.memory_space<vmem>>, %arg2: memref<5x128x128xbf16, #tpu.memory_space<vmem>>, %arg3: memref<5x1x128xf32, #tpu.memory_space<vmem>>, %arg4: memref<128x128xf32, #tpu.memory_space<vmem>>) attributes {dimension_semantics = [#tpu.dimension_semantics<parallel>], iteration_bounds = array<i64: 1>, scalar_prefetch = 0 : i64, scratch_operands = 0 : i64, tpu.core_type = #tpu.core_type<tc>, window_params = [{transform_indices = @transform_0, window_bounds = array<i64: 128, 128>}, {pipeline_mode = #tpu.pipeline_mode<synchronous>, transform_indices = @transform_1, window_bounds = array<i64: 5, 128, 128>}, {pipeline_mode = #tpu.pipeline_mode<synchronous>, transform_indices = @transform_2, window_bounds = array<i64: 5, 1, 128>}, {transform_indices = @transform_3, window_bounds = array<i64: 128, 128>}]} {
    %c0 = arith.constant 0 : index
    %c0_0 = arith.constant 0 : index
    %0 = vector.load %arg1[%c0, %c0_0] : memref<128x128xbf16, #tpu.memory_space<vmem>>, vector<128x128xbf16>
    %c0_1 = arith.constant 0 : index
    %c0_2 = arith.constant 0 : index
    %c0_3 = arith.constant 0 : index
    %1 = vector.load %arg2[%c0_1, %c0_2, %c0_3] : memref<5x128x128xbf16, #tpu.memory_space<vmem>>, vector<1x128x128xbf16>
    %2 = vector.shape_cast %1 : vector<1x128x128xbf16> to vector<128x128xbf16>
    %cst = arith.constant dense<0.000000e+00> : vector<128x128xf32>
    %3 = tpu.matmul %0, %2, %cst {dimension_numbers = #tpu.dot_dimension_numbers<[1], [0], [0], [1], [0, 0, 1, 1], [], []>} : vector<128x128xbf16>, vector<128x128xbf16>, vector<128x128xf32> -> vector<128x128xf32>
    %c0_4 = arith.constant 0 : index
    %c0_5 = arith.constant 0 : index
    %c0_6 = arith.constant 0 : index
    %4 = vector.load %arg3[%c0_4, %c0_5, %c0_6] : memref<5x1x128xf32, #tpu.memory_space<vmem>>, vector<1x1x128xf32>
    %5 = vector.shape_cast %4 : vector<1x1x128xf32> to vector<1x128xf32>
    %6 = vector.broadcast %5 : vector<1x128xf32> to vector<128x128xf32>
    %7 = arith.addf %3, %6 : vector<128x128xf32>
    %cst_7 = arith.constant 0.000000e+00 : f32
    %8 = vector.broadcast %cst_7 : f32 to vector<128x128xf32>
    %9 = arith.maximumf %7, %8 : vector<128x128xf32>
    %10 = arith.truncf %9 : vector<128x128xf32> to vector<128x128xbf16>
    %c1 = arith.constant 1 : index
    %c0_8 = arith.constant 0 : index
    %c0_9 = arith.constant 0 : index
    %11 = vector.load %arg2[%c1, %c0_8, %c0_9] : memref<5x128x128xbf16, #tpu.memory_space<vmem>>, vector<1x128x128xbf16>
    %12 = vector.shape_cast %11 : vector<1x128x128xbf16> to vector<128x128xbf16>
    %cst_10 = arith.constant dense<0.000000e+00> : vector<128x128xf32>
    %13 = tpu.matmul %10, %12, %cst_10 {dimension_numbers = #tpu.dot_dimension_numbers<[1], [0], [0], [1], [0, 0, 1, 1], [], []>} : vector<128x128xbf16>, vector<128x128xbf16>, vector<128x128xf32> -> vector<128x128xf32>
    %c1_11 = arith.constant 1 : index
    %c0_12 = arith.constant 0 : index
    %c0_13 = arith.constant 0 : index
    %14 = vector.load %arg3[%c1_11, %c0_12, %c0_13] : memref<5x1x128xf32, #tpu.memory_space<vmem>>, vector<1x1x128xf32>
    %15 = vector.shape_cast %14 : vector<1x1x128xf32> to vector<1x128xf32>
    %16 = vector.broadcast %15 : vector<1x128xf32> to vector<128x128xf32>
    %17 = arith.addf %13, %16 : vector<128x128xf32>
    %cst_14 = arith.constant 0.000000e+00 : f32
    %18 = vector.broadcast %cst_14 : f32 to vector<128x128xf32>
    %19 = arith.maximumf %17, %18 : vector<128x128xf32>
    %20 = arith.truncf %19 : vector<128x128xf32> to vector<128x128xbf16>
    %c2 = arith.constant 2 : index
    %c0_15 = arith.constant 0 : index
    %c0_16 = arith.constant 0 : index
    %21 = vector.load %arg2[%c2, %c0_15, %c0_16] : memref<5x128x128xbf16, #tpu.memory_space<vmem>>, vector<1x128x128xbf16>
    %22 = vector.shape_cast %21 : vector<1x128x128xbf16> to vector<128x128xbf16>
    %cst_17 = arith.constant dense<0.000000e+00> : vector<128x128xf32>
    %23 = tpu.matmul %20, %22, %cst_17 {dimension_numbers = #tpu.dot_dimension_numbers<[1], [0], [0], [1], [0, 0, 1, 1], [], []>} : vector<128x128xbf16>, vector<128x128xbf16>, vector<128x128xf32> -> vector<128x128xf32>
    %c2_18 = arith.constant 2 : index
    %c0_19 = arith.constant 0 : index
    %c0_20 = arith.constant 0 : index
    %24 = vector.load %arg3[%c2_18, %c0_19, %c0_20] : memref<5x1x128xf32, #tpu.memory_space<vmem>>, vector<1x1x128xf32>
    %25 = vector.shape_cast %24 : vector<1x1x128xf32> to vector<1x128xf32>
    %26 = vector.broadcast %25 : vector<1x128xf32> to vector<128x128xf32>
    %27 = arith.addf %23, %26 : vector<128x128xf32>
    %cst_21 = arith.constant 0.000000e+00 : f32
    %28 = vector.broadcast %cst_21 : f32 to vector<128x128xf32>
    %29 = arith.maximumf %27, %28 : vector<128x128xf32>
    %30 = arith.truncf %29 : vector<128x128xf32> to vector<128x128xbf16>
    %c3 = arith.constant 3 : index
    %c0_22 = arith.constant 0 : index
    %c0_23 = arith.constant 0 : index
    %31 = vector.load %arg2[%c3, %c0_22, %c0_23] : memref<5x128x128xbf16, #tpu.memory_space<vmem>>, vector<1x128x128xbf16>
    %32 = vector.shape_cast %31 : vector<1x128x128xbf16> to vector<128x128xbf16>
    %cst_24 = arith.constant dense<0.000000e+00> : vector<128x128xf32>
    %33 = tpu.matmul %30, %32, %cst_24 {dimension_numbers = #tpu.dot_dimension_numbers<[1], [0], [0], [1], [0, 0, 1, 1], [], []>} : vector<128x128xbf16>, vector<128x128xbf16>, vector<128x128xf32> -> vector<128x128xf32>
    %c3_25 = arith.constant 3 : index
    %c0_26 = arith.constant 0 : index
    %c0_27 = arith.constant 0 : index
    %34 = vector.load %arg3[%c3_25, %c0_26, %c0_27] : memref<5x1x128xf32, #tpu.memory_space<vmem>>, vector<1x1x128xf32>
    %35 = vector.shape_cast %34 : vector<1x1x128xf32> to vector<1x128xf32>
    %36 = vector.broadcast %35 : vector<1x128xf32> to vector<128x128xf32>
    %37 = arith.addf %33, %36 : vector<128x128xf32>
    %cst_28 = arith.constant 0.000000e+00 : f32
    %38 = vector.broadcast %cst_28 : f32 to vector<128x128xf32>
    %39 = arith.maximumf %37, %38 : vector<128x128xf32>
    %40 = arith.truncf %39 : vector<128x128xf32> to vector<128x128xbf16>
    %c4 = arith.constant 4 : index
    %c0_29 = arith.constant 0 : index
    %c0_30 = arith.constant 0 : index
    %41 = vector.load %arg2[%c4, %c0_29, %c0_30] : memref<5x128x128xbf16, #tpu.memory_space<vmem>>, vector<1x128x128xbf16>
    %42 = vector.shape_cast %41 : vector<1x128x128xbf16> to vector<128x128xbf16>
    %cst_31 = arith.constant dense<0.000000e+00> : vector<128x128xf32>
    %43 = tpu.matmul %40, %42, %cst_31 {dimension_numbers = #tpu.dot_dimension_numbers<[1], [0], [0], [1], [0, 0, 1, 1], [], []>} : vector<128x128xbf16>, vector<128x128xbf16>, vector<128x128xf32> -> vector<128x128xf32>
    %c4_32 = arith.constant 4 : index
    %c0_33 = arith.constant 0 : index
    %c0_34 = arith.constant 0 : index
    %44 = vector.load %arg3[%c4_32, %c0_33, %c0_34] : memref<5x1x128xf32, #tpu.memory_space<vmem>>, vector<1x1x128xf32>
    %45 = vector.shape_cast %44 : vector<1x1x128xf32> to vector<1x128xf32>
    %46 = vector.broadcast %45 : vector<1x128xf32> to vector<128x128xf32>
    %47 = arith.addf %43, %46 : vector<128x128xf32>
    %c0_35 = arith.constant 0 : index
    %c0_36 = arith.constant 0 : index
    %48 = vector.load %arg4[%c0_35, %c0_36] : memref<128x128xf32, #tpu.memory_space<vmem>>, vector<128x128xf32>
    tpu.vector_store %arg4[%c0_35, %c0_36], %47 {strides = array<i32>} : memref<128x128xf32, #tpu.memory_space<vmem>>, vector<128x128xf32>,
    return
  }
  func.func @transform_0(%arg0: i32) -> (i32, i32) {
    %c0_i32 = arith.constant 0 : i32
    %c0_i32_0 = arith.constant 0 : i32
    return %arg0, %c0_i32 : i32, i32
  }
  func.func @transform_1(%arg0: i32) -> (i32, i32, i32) {
    %c0_i32 = arith.constant 0 : i32
    %c0_i32_0 = arith.constant 0 : i32
    %c0_i32_1 = arith.constant 0 : i32
    %c0_i32_2 = arith.constant 0 : i32
    return %c0_i32, %c0_i32_0, %c0_i32_1 : i32, i32, i32
  }
  func.func @transform_2(%arg0: i32) -> (i32, i32, i32) {
    %c0_i32 = arith.constant 0 : i32
    %c0_i32_0 = arith.constant 0 : i32
    %c0_i32_1 = arith.constant 0 : i32
    %c0_i32_2 = arith.constant 0 : i32
    return %c0_i32, %c0_i32_0, %c0_i32_1 : i32, i32, i32
  }
  func.func @transform_3(%arg0: i32) -> (i32, i32) {
    %c0_i32 = arith.constant 0 : i32
    %c0_i32_0 = arith.constant 0 : i32
    return %arg0, %c0_i32 : i32, i32
  }
}

</mosaic_0001>

<bundles_post_ra>
// kernel: tpu_custom_call.1
= control target key start
LH: loop header
LB: loop body
LE: loop exit
PB: predicated region body
PF: predicated region fallthrough
CT: control target
= control target key end

     0   :  { %8 = vsyncpa [#allocation3], 0  ;;  %s1328_s0 = inlined_call_operand.hbm [shape: bf16[128,128], index: 0, kind: input, shape index: {}]   ;;  %s1329_s1 = inlined_call_operand.hbm [shape: bf16[5,128,128], index: 1, kind: input, shape index: {}]   ;;  %s1330_s2 = inlined_call_operand.hbm [shape: f32[5,1,128], index: 2, kind: input, shape index: {}]   ;;  %s1331_s3 = inlined_call_operand.hbm [shape: f32[128,128], index: 3, kind: output, shape index: {}]  }
   0x1   :  { %9 = vsyncpa [#allocation6], 0 }
   0x2   :  { %10 = vsyncpa [#allocation4], 0  ;;  %s28_s14 = sshll.u32 %s1329_s1, 4  ;;  %s1232_s15 = smov [#allocation5]   ;;  %s29_s14 = int_to_ptr.hbm [resolvable:$true] %s28_s14 }
   0x3   :  { %s30_s16 = sshll.u32 %s1232_s15, 4  ;;  %s15_s19 = sshll.u32 %s1328_s0, 4  ;;  %s31_s16 = int_to_ptr.vmem [resolvable:$true] %s30_s16  ;;  %s16_s19 = int_to_ptr.hbm [resolvable:$true] %s15_s19 }
   0x4   :  { %s1233_s20 = smov 64   ;;  %s1234_s21 = smov 4  }
   0x5   :  { %36 = dma.hbm_to_vmem [thread:$0]  %s29_s14, 5120, %s31_s16, [#allocation6], %s1233_s20, %s1233_s20, %s1234_s21  }
   0x6   :  { %s1235_s22 = smov [#allocation2]   ;;  %s41_s26 = sshll.u32 %s1330_s2, 4  ;;  %s42_s26 = int_to_ptr.hbm [resolvable:$true] %s41_s26 }
   0x7   :  { %s17_s23 = sshll.u32 %s1235_s22, 4  ;;  %s1236_s1 = smov [#allocation7]   ;;  %s18_s23 = int_to_ptr.vmem [resolvable:$true] %s17_s23 }
   0x8   :  { %23 = dma.hbm_to_vmem [thread:$0]  %s16_s19, 1024, %s18_s23, [#allocation3], %s1233_s20, %s1233_s20, %s1234_s21  }
   0x9   :  { %s43_s27 = sshll.u32 %s1236_s1, 4  ;;  %s1237_s28 = smov 16   ;;  %s44_s27 = int_to_ptr.vmem [resolvable:$true] %s43_s27 }
   0xa   :  { %s1238_s29 = smov 1  }
   0xb   :  { %49 = dma.hbm_to_vmem [thread:$0]  %s42_s26, 80, %s44_s27, [#allocation6], %s1237_s28, %s1237_s28, %s1238_s29  }
   0xc   :  { %1226 = dma.done.wait [#allocation3], 1024  }
   0xd   :  { %1227 = vsyncadd [#allocation3], 4294966272 }
   0xe   :  { %1228 = dma.done.wait [#allocation6], 5200  }
   0xf   :  { %1229 = vsyncadd [#allocation6], 4294962096  ;;  %v1058_v0 = vld [vmem:[#allocation5 + $0x38] sm:$0xff]  ;;  %v1057_v1 = vld [vmem:[#allocation5 + $0x30] sm:$0xff]  ;;  %s1239_s0 = smov [#allocation8]   ;;  %s837_s5 = sshll.u32 %s1331_s3, 4  ;;  %s838_s5 = int_to_ptr.hbm [resolvable:$true] %s837_s5 }
  0x10   :  { %194 = vmatpush.bf16.msra.mxu0 %v1058_v0  ;;  %1091 = vmatpush.bf16.msra.mxu1 %v1058_v0  ;;  %v1056_v2 = vld [vmem:[#allocation5 + $0x28] sm:$0xff]  ;;  %v1055_v3 = vld [vmem:[#allocation5 + $0x20] sm:$0xff]  ;;  %v1054_v4 = vld [vmem:[#allocation5 + $0x18] sm:$0xff]  ;;  %s835_s2 = sshll.u32 %s1239_s0, 4  ;;  %s1240_s6 = smov 128   ;;  %s836_s2 = int_to_ptr.vmem [resolvable:$true] %s835_s2 }
  0x11   :  { %1092 = vmatpush.bf16.msra.mxu2 %v1058_v0  ;;  %1093 = vmatpush.bf16.msra.mxu3 %v1058_v0  ;;  %v1053_v5 = vld [vmem:[#allocation5 + $0x10] sm:$0xff]  ;;  %v1052_v6 = vld [vmem:[#allocation5 + $0x8] sm:$0xff]  ;;  %v1051_v7 = vld [vmem:[#allocation5] sm:$0xff]  ;;  %s1241_s7 = smov 8  }
  0x12   :  { %v1066_v8 = vld [vmem:[#allocation5 + $0x78] sm:$0xff]  ;;  %v1043_v9 = vld [vmem:[#allocation2] sm:$0xff]  ;;  %v1045_v10 = vld [vmem:[#allocation2 + $0x10] sm:$0xff] }
  0x13   :  { %v1047_v11 = vld [vmem:[#allocation2 + $0x20] sm:$0xff]  ;;  %v1049_v12 = vld [vmem:[#allocation2 + $0x30] sm:$0xff]  ;;  %v1064_v14 = vld [vmem:[#allocation5 + $0x68] sm:$0xff] }
  0x14   :  { %195 = vmatpush.bf16.msra.mxu0 %v1057_v1  ;;  %1094 = vmatpush.bf16.msra.mxu1 %v1057_v1  ;;  %v1065_v13 = vld [vmem:[#allocation5 + $0x70] sm:$0xff]  ;;  %v1063_v15 = vld [vmem:[#allocation5 + $0x60] sm:$0xff]  ;;  %v1062_v16 = vld [vmem:[#allocation5 + $0x58] sm:$0xff] }
  0x15   :  { %1095 = vmatpush.bf16.msra.mxu2 %v1057_v1  ;;  %1096 = vmatpush.bf16.msra.mxu3 %v1057_v1  ;;  %v1044_v17 = vld [vmem:[#allocation2 + $0x8] sm:$0xff]  ;;  %v1046_v18 = vld [vmem:[#allocation2 + $0x18] sm:$0xff]  ;;  %v1061_v21 = vld [vmem:[#allocation5 + $0x50] sm:$0xff] }
  0x16   :  { %v1048_v19 = vld [vmem:[#allocation2 + $0x28] sm:$0xff]  ;;  %v1050_v20 = vld [vmem:[#allocation2 + $0x38] sm:$0xff]  ;;  %v1059_v23 = vld [vmem:[#allocation5 + $0x40] sm:$0xff] }
  0x17   :  { %v1060_v22 = vld [vmem:[#allocation5 + $0x48] sm:$0xff]  ;;  %v1271_v25 = vld [vmem:[#allocation7] ss:$0 sm:$0xff]  ;;  %v1074_v61 = vld [vmem:[#allocation5 + $0xb8] sm:$0xff] }
  0x18   :  { %196 = vmatpush.bf16.msra.mxu0 %v1056_v2  ;;  %1097 = vmatpush.bf16.msra.mxu1 %v1056_v2 }
  0x19   :  { %1098 = vmatpush.bf16.msra.mxu2 %v1056_v2  ;;  %1099 = vmatpush.bf16.msra.mxu3 %v1056_v2 }
  0x1c   :  { %197 = vmatpush.bf16.msra.mxu0 %v1055_v3  ;;  %1100 = vmatpush.bf16.msra.mxu1 %v1055_v3 }
  0x1d   :  { %1101 = vmatpush.bf16.msra.mxu2 %v1055_v3  ;;  %1102 = vmatpush.bf16.msra.mxu3 %v1055_v3 }
  0x20   :  { %198 = vmatpush.bf16.msra.mxu0 %v1054_v4  ;;  %1103 = vmatpush.bf16.msra.mxu1 %v1054_v4 }
  0x21   :  { %1104 = vmatpush.bf16.msra.mxu2 %v1054_v4  ;;  %1105 = vmatpush.bf16.msra.mxu3 %v1054_v4 }
  0x24   :  { %199 = vmatpush.bf16.msra.mxu0 %v1053_v5  ;;  %1106 = vmatpush.bf16.msra.mxu1 %v1053_v5 }
  0x25   :  { %1107 = vmatpush.bf16.msra.mxu2 %v1053_v5  ;;  %1108 = vmatpush.bf16.msra.mxu3 %v1053_v5 }
  0x28   :  { %200 = vmatpush.bf16.msra.mxu0 %v1052_v6  ;;  %1109 = vmatpush.bf16.msra.mxu1 %v1052_v6 }
  0x29   :  { %1110 = vmatpush.bf16.msra.mxu2 %v1052_v6  ;;  %1111 = vmatpush.bf16.msra.mxu3 %v1052_v6  ;;  %v1073_v6 = vld [vmem:[#allocation5 + $0xb0] sm:$0xff] }
  0x2c   :  { %201 = vmatpush.bf16.msra.mxu0 %v1051_v7  ;;  %1112 = vmatpush.bf16.msra.mxu1 %v1051_v7 }
  0x2d   :  { %1113 = vmatpush.bf16.msra.mxu2 %v1051_v7  ;;  %1114 = vmatpush.bf16.msra.mxu3 %v1051_v7  ;;  %v1072_v7 = vld [vmem:[#allocation5 + $0xa8] sm:$0xff] }
  0x2f   :  { %202 = vmatmul.bf16.vlgmr.msra.gmra.mxu0 %v1043_v9  ;;  %212 = vmatmul.bf16.vlgmr.msra.gmra.mxu1 %v1045_v10 }
  0x30   :  { %337 = vmatpush.bf16.msrb.mxu1 %v1066_v8  ;;  %222 = vmatmul.bf16.vlgmr.msra.gmra.mxu2 %v1047_v11  ;;  %v1071_v8 = vld [vmem:[#allocation5 + $0xa0] sm:$0xff] }
  0x31   :  { %232 = vmatmul.bf16.vlgmr.msra.gmra.mxu3 %v1049_v12  ;;  %480 = vmatpush.bf16.msrb.mxu2 %v1074_v61  ;;  %v1070_v12 = vld [vmem:[#allocation5 + $0x98] sm:$0xff] }
  0x34   :  { %338 = vmatpush.bf16.msrb.mxu1 %v1065_v13 }
  0x35   :  { %481 = vmatpush.bf16.msrb.mxu2 %v1073_v6  ;;  %v1081_v6 = vld [vmem:[#allocation5 + $0xf0] sm:$0xff] }
  0x38   :  { %339 = vmatpush.bf16.msrb.mxu1 %v1064_v14 }
  0x39   :  { %482 = vmatpush.bf16.msrb.mxu2 %v1072_v7  ;;  %v1080_v7 = vld [vmem:[#allocation5 + $0xe8] sm:$0xff] }
  0x3c   :  { %340 = vmatpush.bf16.msrb.mxu1 %v1063_v15 }
  0x3d   :  { %483 = vmatpush.bf16.msrb.mxu2 %v1071_v8 }
  0x3f   :  { %207 = vmatmul.bf16.gmra.mxu0 %v1044_v17  ;;  %217 = vmatmul.bf16.gmra.mxu1 %v1046_v18  ;;  %v1068_v17 = vld [vmem:[#allocation5 + $0x88] sm:$0xff] }
  0x40   :  { %341 = vmatpush.bf16.msrb.mxu1 %v1062_v16  ;;  %227 = vmatmul.bf16.gmra.mxu2 %v1048_v19  ;;  %v1069_v16 = vld [vmem:[#allocation5 + $0x90] sm:$0xff] }
  0x41   :  { %237 = vmatmul.bf16.gmra.mxu3 %v1050_v20  ;;  %484 = vmatpush.bf16.msrb.mxu2 %v1070_v12 }
  0x44   :  { %342 = vmatpush.bf16.msrb.mxu1 %v1061_v21  ;;  %v1067_v21 = vld [vmem:[#allocation5 + $0x80] sm:$0xff] }
  0x45   :  { %485 = vmatpush.bf16.msrb.mxu2 %v1069_v16 }
  0x48   :  { %343 = vmatpush.bf16.msrb.mxu1 %v1060_v22 }
  0x49   :  { %486 = vmatpush.bf16.msrb.mxu2 %v1068_v17  ;;  %v1077_v17 = vld [vmem:[#allocation5 + $0xd0] sm:$0xff] }
  0x4c   :  { %344 = vmatpush.bf16.msrb.mxu1 %v1059_v23 }
  0x4d   :  { %487 = vmatpush.bf16.msrb.mxu2 %v1067_v21 }
  0xac   :  { %v203_v24 = vpop.f32.mrf.mxu0  ;;  %v213_v33 = vpop.f32.mrf.mxu1 }
  0xad   :  { %v204_v26 = vadd.f32 %v1271_v25, %v203_v24  ;;  %v214_v41 = vadd.f32 %v1271_v25, %v213_v33 }
  0xaf   :  { %v243_v29 = vmax.f32 %v204_v26, 0.0  ;;  %v247_v44 = vmax.f32 %v214_v41, 0.0 }
  0xb3   :  { %v223_v48 = vpop.f32.mrf.mxu2 }
  0xb4   :  { %v205_v27 = vpop.f32.mrf.mxu0  ;;  %v215_v40 = vpop.f32.mrf.mxu1  ;;  %v224_v55 = vadd.f32 %v1271_v25, %v223_v48 }
  0xb5   :  { %v206_v28 = vadd.f32 %v1271_v25, %v205_v27  ;;  %v216_v42 = vadd.f32 %v1271_v25, %v215_v40  ;;  %v233_v63 = vpop.f32.mrf.mxu3  ;;  %v1289_v27 = vld [vmem:[#allocation7 + $0x1] ss:$0 sm:$0xff] }
  0xb6   :  { %v251_v58 = vmax.f32 %v224_v55, 0.0  ;;  %v234_v9 = vadd.f32 %v1271_v25, %v233_v63 }
  0xb7   :  { %v244_v30 = vmax.f32 %v206_v28, 0.0  ;;  %v248_v45 = vmax.f32 %v216_v42, 0.0 }
  0xb8   :  { %v255_v13 = vmax.f32 %v234_v9, 0.0 }
  0xb9   :  { %v259_v31 = vpack.c.bf16 %v244_v30, %v243_v29  ;;  %v261_v46 = vpack.c.bf16 %v248_v45, %v247_v44 }
  0xbb   :  { %345 = vmatmul.bf16.vlgmr.msrb.gmra.mxu1 %v259_v31  ;;  %v225_v54 = vpop.f32.mrf.mxu2 }
  0xbc   :  { %v208_v32 = vpop.f32.mrf.mxu0  ;;  %v218_v43 = vpop.f32.mrf.mxu1  ;;  %v226_v56 = vadd.f32 %v1271_v25, %v225_v54 }
  0xbd   :  { %v209_v34 = vadd.f32 %v1271_v25, %v208_v32  ;;  %v219_v49 = vadd.f32 %v1271_v25, %v218_v43  ;;  %v235_v5 = vpop.f32.mrf.mxu3 }
  0xbe   :  { %v252_v59 = vmax.f32 %v226_v56, 0.0  ;;  %v236_v10 = vadd.f32 %v1271_v25, %v235_v5 }
  0xbf   :  { %v245_v37 = vmax.f32 %v209_v34, 0.0  ;;  %v249_v51 = vmax.f32 %v219_v49, 0.0 }
  0xc0   :  { %v263_v60 = vpack.c.bf16 %v252_v59, %v251_v58  ;;  %v256_v14 = vmax.f32 %v236_v10, 0.0 }
  0xc2   :  { %v265_v15 = vpack.c.bf16 %v256_v14, %v255_v13 }
  0xc3   :  { %v228_v57 = vpop.f32.mrf.mxu2 }
  0xc4   :  { %v210_v35 = vpop.f32.mrf.mxu0  ;;  %v220_v47 = vpop.f32.mrf.mxu1  ;;  %v229_v0 = vadd.f32 %v1271_v25, %v228_v57 }
  0xc5   :  { %v211_v36 = vadd.f32 %v1271_v25, %v210_v35  ;;  %v221_v50 = vadd.f32 %v1271_v25, %v220_v47  ;;  %v238_v11 = vpop.f32.mrf.mxu3 }
  0xc6   :  { %v253_v2 = vmax.f32 %v229_v0, 0.0  ;;  %v239_v19 = vadd.f32 %v1271_v25, %v238_v11  ;;  %v1079_v11 = vld [vmem:[#allocation5 + $0xe0] sm:$0xff] }
  0xc7   :  { %v246_v38 = vmax.f32 %v211_v36, 0.0  ;;  %v250_v52 = vmax.f32 %v221_v50, 0.0 }
  0xc8   :  { %v257_v22 = vmax.f32 %v239_v19, 0.0 }
  0xc9   :  { %v260_v39 = vpack.c.bf16 %v246_v38, %v245_v37  ;;  %v262_v53 = vpack.c.bf16 %v250_v52, %v249_v51 }
  0xcb   :  { %350 = vmatmul.bf16.gmra.mxu1 %v260_v39  ;;  %v230_v62 = vpop.f32.mrf.mxu2 }
  0xcc   :  { %v231_v1 = vadd.f32 %v1271_v25, %v230_v62 }
  0xcd   :  { %v240_v18 = vpop.f32.mrf.mxu3 }
  0xce   :  { %v254_v3 = vmax.f32 %v231_v1, 0.0  ;;  %v241_v20 = vadd.f32 %v1271_v25, %v240_v18  ;;  %v1076_v18 = vld [vmem:[#allocation5 + $0xc8] sm:$0xff] }
  0xd0   :  { %v264_v4 = vpack.c.bf16 %v254_v3, %v253_v2  ;;  %v258_v23 = vmax.f32 %v241_v20, 0.0 }
  0xd2   :  { %v266_v24 = vpack.c.bf16 %v258_v23, %v257_v22 }
  0xdb   :  { %355 = vmatmul.bf16.gmra.mxu1 %v261_v46 }
  0xeb   :  { %360 = vmatmul.bf16.gmra.mxu1 %v262_v53 }
  0xfb   :  { %365 = vmatmul.bf16.gmra.mxu1 %v263_v60 }
 0x10b   :  { %370 = vmatmul.bf16.gmra.mxu1 %v264_v4  ;;  %v1082_v4 = vld [vmem:[#allocation5 + $0xf8] sm:$0xff] }
 0x10c   :  { %623 = vmatpush.bf16.msrb.mxu3 %v1082_v4 }
 0x110   :  { %624 = vmatpush.bf16.msrb.mxu3 %v1081_v6 }
 0x114   :  { %625 = vmatpush.bf16.msrb.mxu3 %v1080_v7  ;;  %v1089_v7 = vld [vmem:[#allocation5 + $0x130] sm:$0xff] }
 0x118   :  { %626 = vmatpush.bf16.msrb.mxu3 %v1079_v11 }
 0x11b   :  { %375 = vmatmul.bf16.gmra.mxu1 %v265_v15  ;;  %v1078_v15 = vld [vmem:[#allocation5 + $0xd8] sm:$0xff] }
 0x11c   :  { %627 = vmatpush.bf16.msrb.mxu3 %v1078_v15 }
 0x120   :  { %628 = vmatpush.bf16.msrb.mxu3 %v1077_v17 }
 0x124   :  { %629 = vmatpush.bf16.msrb.mxu3 %v1076_v18  ;;  %v1085_v18 = vld [vmem:[#allocation5 + $0x110] sm:$0xff] }
 0x12b   :  { %380 = vmatmul.bf16.gmra.mxu1 %v266_v24  ;;  %v1075_v24 = vld [vmem:[#allocation5 + $0xc0] sm:$0xff] }
 0x12c   :  { %630 = vmatpush.bf16.msrb.mxu3 %v1075_v24 }
 0x138   :  { %v346_v26 = vpop.f32.mrf.mxu1 }
 0x139   :  { %v347_v28 = vadd.f32 %v1289_v27, %v346_v26 }
 0x13b   :  { %v386_v31 = vmax.f32 %v347_v28, 0.0 }
 0x140   :  { %v348_v29 = vpop.f32.mrf.mxu1 }
 0x141   :  { %v349_v30 = vadd.f32 %v1289_v27, %v348_v29  ;;  %v1307_v29 = vld [vmem:[#allocation7 + $0x2] ss:$0 sm:$0xff] }
 0x143   :  { %v387_v32 = vmax.f32 %v349_v30, 0.0 }
 0x145   :  { %v402_v33 = vpack.c.bf16 %v387_v32, %v386_v31 }
 0x147   :  { %488 = vmatmul.bf16.vlgmr.msrb.gmra.mxu2 %v402_v33 }
 0x148   :  { %v351_v34 = vpop.f32.mrf.mxu1 }
 0x149   :  { %v352_v25 = vadd.f32 %v1289_v27, %v351_v34 }
 0x14b   :  { %v388_v37 = vmax.f32 %v352_v25, 0.0 }
 0x150   :  { %v353_v35 = vpop.f32.mrf.mxu1 }
 0x151   :  { %v354_v36 = vadd.f32 %v1289_v27, %v353_v35 }
 0x153   :  { %v389_v38 = vmax.f32 %v354_v36, 0.0 }
 0x155   :  { %v403_v39 = vpack.c.bf16 %v389_v38, %v388_v37 }
 0x157   :  { %493 = vmatmul.bf16.gmra.mxu2 %v403_v39 }
 0x158   :  { %v356_v40 = vpop.f32.mrf.mxu1 }
 0x159   :  { %v357_v41 = vadd.f32 %v1289_v27, %v356_v40 }
 0x15b   :  { %v390_v44 = vmax.f32 %v357_v41, 0.0 }
 0x160   :  { %v358_v42 = vpop.f32.mrf.mxu1 }
 0x161   :  { %v359_v43 = vadd.f32 %v1289_v27, %v358_v42 }
 0x163   :  { %v391_v45 = vmax.f32 %v359_v43, 0.0 }
 0x165   :  { %v404_v46 = vpack.c.bf16 %v391_v45, %v390_v44 }
 0x167   :  { %498 = vmatmul.bf16.gmra.mxu2 %v404_v46 }
 0x168   :  { %v361_v47 = vpop.f32.mrf.mxu1 }
 0x169   :  { %v362_v48 = vadd.f32 %v1289_v27, %v361_v47 }
 0x16b   :  { %v392_v51 = vmax.f32 %v362_v48, 0.0 }
 0x170   :  { %v363_v49 = vpop.f32.mrf.mxu1 }
 0x171   :  { %v364_v50 = vadd.f32 %v1289_v27, %v363_v49 }
 0x173   :  { %v393_v52 = vmax.f32 %v364_v50, 0.0 }
 0x175   :  { %v405_v53 = vpack.c.bf16 %v393_v52, %v392_v51 }
 0x177   :  { %503 = vmatmul.bf16.gmra.mxu2 %v405_v53 }
 0x178   :  { %v366_v54 = vpop.f32.mrf.mxu1 }
 0x179   :  { %v367_v55 = vadd.f32 %v1289_v27, %v366_v54 }
 0x17b   :  { %v394_v58 = vmax.f32 %v367_v55, 0.0 }
 0x180   :  { %v368_v56 = vpop.f32.mrf.mxu1 }
 0x181   :  { %v369_v57 = vadd.f32 %v1289_v27, %v368_v56 }
 0x183   :  { %v395_v59 = vmax.f32 %v369_v57, 0.0 }
 0x185   :  { %v406_v60 = vpack.c.bf16 %v395_v59, %v394_v58 }
 0x187   :  { %508 = vmatmul.bf16.gmra.mxu2 %v406_v60 }
 0x188   :  { %v371_v61 = vpop.f32.mrf.mxu1 }
 0x189   :  { %v372_v62 = vadd.f32 %v1289_v27, %v371_v61 }
 0x18b   :  { %v396_v1 = vmax.f32 %v372_v62, 0.0 }
 0x190   :  { %v373_v63 = vpop.f32.mrf.mxu1 }
 0x191   :  { %v374_v0 = vadd.f32 %v1289_v27, %v373_v63 }
 0x193   :  { %v397_v2 = vmax.f32 %v374_v0, 0.0 }
 0x195   :  { %v407_v3 = vpack.c.bf16 %v397_v2, %v396_v1 }
 0x197   :  { %513 = vmatmul.bf16.gmra.mxu2 %v407_v3 }
 0x198   :  { %v376_v5 = vpop.f32.mrf.mxu1 }
 0x199   :  { %v377_v8 = vadd.f32 %v1289_v27, %v376_v5  ;;  %v1090_v5 = vld [vmem:[#allocation5 + $0x138] sm:$0xff] }
 0x19a   :  { %766 = vmatpush.bf16.msrb.mxu0 %v1090_v5 }
 0x19b   :  { %v398_v12 = vmax.f32 %v377_v8, 0.0  ;;  %v1088_v8 = vld [vmem:[#allocation5 + $0x128] sm:$0xff] }
 0x19e   :  { %767 = vmatpush.bf16.msrb.mxu0 %v1089_v7 }
 0x1a0   :  { %v378_v9 = vpop.f32.mrf.mxu1 }
 0x1a1   :  { %v379_v10 = vadd.f32 %v1289_v27, %v378_v9 }
 0x1a2   :  { %768 = vmatpush.bf16.msrb.mxu0 %v1088_v8 }
 0x1a3   :  { %v399_v13 = vmax.f32 %v379_v10, 0.0 }
 0x1a5   :  { %v408_v14 = vpack.c.bf16 %v399_v13, %v398_v12  ;;  %v1087_v12 = vld [vmem:[#allocation5 + $0x120] sm:$0xff] }
 0x1a6   :  { %769 = vmatpush.bf16.msrb.mxu0 %v1087_v12 }
 0x1a7   :  { %518 = vmatmul.bf16.gmra.mxu2 %v408_v14 }
 0x1a8   :  { %v381_v16 = vpop.f32.mrf.mxu1 }
 0x1a9   :  { %v382_v19 = vadd.f32 %v1289_v27, %v381_v16  ;;  %v1086_v16 = vld [vmem:[#allocation5 + $0x118] sm:$0xff] }
 0x1aa   :  { %770 = vmatpush.bf16.msrb.mxu0 %v1086_v16 }
 0x1ab   :  { %v400_v22 = vmax.f32 %v382_v19, 0.0  ;;  %v1084_v19 = vld [vmem:[#allocation5 + $0x108] sm:$0xff] }
 0x1ae   :  { %771 = vmatpush.bf16.msrb.mxu0 %v1085_v18 }
 0x1b0   :  { %v383_v20 = vpop.f32.mrf.mxu1 }
 0x1b1   :  { %v384_v21 = vadd.f32 %v1289_v27, %v383_v20 }
 0x1b2   :  { %772 = vmatpush.bf16.msrb.mxu0 %v1084_v19 }
 0x1b3   :  { %v401_v23 = vmax.f32 %v384_v21, 0.0 }
 0x1b5   :  { %v409_v26 = vpack.c.bf16 %v401_v23, %v400_v22 }
 0x1b7   :  { %523 = vmatmul.bf16.gmra.mxu2 %v409_v26  ;;  %v1083_v26 = vld [vmem:[#allocation5 + $0x100] sm:$0xff] }
 0x1b8   :  { %773 = vmatpush.bf16.msrb.mxu0 %v1083_v26 }
 0x1ca   :  { %v489_v28 = vpop.f32.mrf.mxu2 }
 0x1cb   :  { %v490_v30 = vadd.f32 %v1307_v29, %v489_v28 }
 0x1cd   :  { %v529_v33 = vmax.f32 %v490_v30, 0.0 }
 0x1d2   :  { %v491_v31 = vpop.f32.mrf.mxu2 }
 0x1d3   :  { %v492_v32 = vadd.f32 %v1307_v29, %v491_v31  ;;  %v1128_v31 = vld [vmem:[#allocation7 + $0x3] ss:$0 sm:$0xff] }
 0x1d5   :  { %v530_v34 = vmax.f32 %v492_v32, 0.0 }
 0x1d7   :  { %v545_v25 = vpack.c.bf16 %v530_v34, %v529_v33 }
 0x1d9   :  { %631 = vmatmul.bf16.vlgmr.msrb.gmra.mxu3 %v545_v25 }
 0x1da   :  { %v494_v27 = vpop.f32.mrf.mxu2 }
 0x1db   :  { %v495_v35 = vadd.f32 %v1307_v29, %v494_v27 }
 0x1dd   :  { %v531_v38 = vmax.f32 %v495_v35, 0.0 }
 0x1e2   :  { %v496_v36 = vpop.f32.mrf.mxu2 }
 0x1e3   :  { %v497_v37 = vadd.f32 %v1307_v29, %v496_v36 }
 0x1e5   :  { %v532_v39 = vmax.f32 %v497_v37, 0.0 }
 0x1e7   :  { %v546_v40 = vpack.c.bf16 %v532_v39, %v531_v38 }
 0x1e9   :  { %636 = vmatmul.bf16.gmra.mxu3 %v546_v40 }
 0x1ea   :  { %v499_v41 = vpop.f32.mrf.mxu2 }
 0x1eb   :  { %v500_v42 = vadd.f32 %v1307_v29, %v499_v41 }
 0x1ed   :  { %v533_v45 = vmax.f32 %v500_v42, 0.0 }
 0x1f2   :  { %v501_v43 = vpop.f32.mrf.mxu2 }
 0x1f3   :  { %v502_v44 = vadd.f32 %v1307_v29, %v501_v43 }
 0x1f5   :  { %v534_v46 = vmax.f32 %v502_v44, 0.0 }
 0x1f7   :  { %v547_v47 = vpack.c.bf16 %v534_v46, %v533_v45 }
 0x1f9   :  { %641 = vmatmul.bf16.gmra.mxu3 %v547_v47 }
 0x1fa   :  { %v504_v48 = vpop.f32.mrf.mxu2 }
 0x1fb   :  { %v505_v49 = vadd.f32 %v1307_v29, %v504_v48 }
 0x1fd   :  { %v535_v52 = vmax.f32 %v505_v49, 0.0 }
 0x202   :  { %v506_v50 = vpop.f32.mrf.mxu2 }
 0x203   :  { %v507_v51 = vadd.f32 %v1307_v29, %v506_v50 }
 0x205   :  { %v536_v53 = vmax.f32 %v507_v51, 0.0 }
 0x207   :  { %v548_v54 = vpack.c.bf16 %v536_v53, %v535_v52 }
 0x209   :  { %646 = vmatmul.bf16.gmra.mxu3 %v548_v54 }
 0x20a   :  { %v509_v55 = vpop.f32.mrf.mxu2 }
 0x20b   :  { %v510_v56 = vadd.f32 %v1307_v29, %v509_v55 }
 0x20d   :  { %v537_v59 = vmax.f32 %v510_v56, 0.0 }
 0x212   :  { %v511_v57 = vpop.f32.mrf.mxu2 }
 0x213   :  { %v512_v58 = vadd.f32 %v1307_v29, %v511_v57 }
 0x215   :  { %v538_v60 = vmax.f32 %v512_v58, 0.0 }
 0x217   :  { %v549_v61 = vpack.c.bf16 %v538_v60, %v537_v59 }
 0x219   :  { %651 = vmatmul.bf16.gmra.mxu3 %v549_v61 }
 0x21a   :  { %v514_v62 = vpop.f32.mrf.mxu2 }
 0x21b   :  { %v515_v63 = vadd.f32 %v1307_v29, %v514_v62 }
 0x21d   :  { %v539_v2 = vmax.f32 %v515_v63, 0.0 }
 0x222   :  { %v516_v0 = vpop.f32.mrf.mxu2 }
 0x223   :  { %v517_v1 = vadd.f32 %v1307_v29, %v516_v0 }
 0x225   :  { %v540_v3 = vmax.f32 %v517_v1, 0.0 }
 0x227   :  { %v550_v4 = vpack.c.bf16 %v540_v3, %v539_v2 }
 0x229   :  { %656 = vmatmul.bf16.gmra.mxu3 %v550_v4 }
 0x22a   :  { %v519_v6 = vpop.f32.mrf.mxu2 }
 0x22b   :  { %v520_v9 = vadd.f32 %v1307_v29, %v519_v6 }
 0x22d   :  { %v541_v13 = vmax.f32 %v520_v9, 0.0 }
 0x232   :  { %v521_v10 = vpop.f32.mrf.mxu2 }
 0x233   :  { %v522_v11 = vadd.f32 %v1307_v29, %v521_v10 }
 0x235   :  { %v542_v14 = vmax.f32 %v522_v11, 0.0 }
 0x237   :  { %v551_v15 = vpack.c.bf16 %v542_v14, %v541_v13 }
 0x239   :  { %661 = vmatmul.bf16.gmra.mxu3 %v551_v15 }
 0x23a   :  { %v524_v17 = vpop.f32.mrf.mxu2 }
 0x23b   :  { %v525_v20 = vadd.f32 %v1307_v29, %v524_v17 }
 0x23d   :  { %v543_v23 = vmax.f32 %v525_v20, 0.0  ;;  %v1129_v20 = vld [vmem:[#allocation7 + $0x4] ss:$0 sm:$0xff] }
 0x242   :  { %v526_v21 = vpop.f32.mrf.mxu2 }
 0x243   :  { %v527_v22 = vadd.f32 %v1307_v29, %v526_v21 }
 0x245   :  { %v544_v24 = vmax.f32 %v527_v22, 0.0 }
 0x247   :  { %v552_v28 = vpack.c.bf16 %v544_v24, %v543_v23 }
 0x249   :  { %666 = vmatmul.bf16.gmra.mxu3 %v552_v28 }
 0x25c   :  { %v632_v30 = vpop.f32.mrf.mxu3 }
 0x25d   :  { %v633_v32 = vadd.f32 %v1128_v31, %v632_v30 }
 0x25f   :  { %v672_v25 = vmax.f32 %v633_v32, 0.0 }
 0x264   :  { %v634_v33 = vpop.f32.mrf.mxu3 }
 0x265   :  { %v635_v34 = vadd.f32 %v1128_v31, %v634_v33 }
 0x267   :  { %v673_v27 = vmax.f32 %v635_v34, 0.0 }
 0x269   :  { %v688_v35 = vpack.c.bf16 %v673_v27, %v672_v25 }
 0x26b   :  { %774 = vmatmul.bf16.vlgmr.msrb.gmra.mxu0 %v688_v35 }
 0x26c   :  { %v637_v36 = vpop.f32.mrf.mxu3 }
 0x26d   :  { %v638_v37 = vadd.f32 %v1128_v31, %v637_v36 }
 0x26f   :  { %v674_v39 = vmax.f32 %v638_v37, 0.0 }
 0x274   :  { %v639_v38 = vpop.f32.mrf.mxu3 }
 0x275   :  { %v640_v29 = vadd.f32 %v1128_v31, %v639_v38 }
 0x277   :  { %v675_v40 = vmax.f32 %v640_v29, 0.0 }
 0x279   :  { %v689_v41 = vpack.c.bf16 %v675_v40, %v674_v39 }
 0x27b   :  { %779 = vmatmul.bf16.gmra.mxu0 %v689_v41 }
 0x27c   :  { %v642_v42 = vpop.f32.mrf.mxu3 }
 0x27d   :  { %v643_v43 = vadd.f32 %v1128_v31, %v642_v42 }
 0x27f   :  { %v676_v46 = vmax.f32 %v643_v43, 0.0 }
 0x284   :  { %v644_v44 = vpop.f32.mrf.mxu3 }
 0x285   :  { %v645_v45 = vadd.f32 %v1128_v31, %v644_v44 }
 0x287   :  { %v677_v47 = vmax.f32 %v645_v45, 0.0 }
 0x289   :  { %v690_v48 = vpack.c.bf16 %v677_v47, %v676_v46 }
 0x28b   :  { %784 = vmatmul.bf16.gmra.mxu0 %v690_v48 }
 0x28c   :  { %v647_v49 = vpop.f32.mrf.mxu3 }
 0x28d   :  { %v648_v50 = vadd.f32 %v1128_v31, %v647_v49 }
 0x28f   :  { %v678_v53 = vmax.f32 %v648_v50, 0.0 }
 0x294   :  { %v649_v51 = vpop.f32.mrf.mxu3 }
 0x295   :  { %v650_v52 = vadd.f32 %v1128_v31, %v649_v51 }
 0x297   :  { %v679_v54 = vmax.f32 %v650_v52, 0.0 }
 0x299   :  { %v691_v55 = vpack.c.bf16 %v679_v54, %v678_v53 }
 0x29b   :  { %789 = vmatmul.bf16.gmra.mxu0 %v691_v55 }
 0x29c   :  { %v652_v56 = vpop.f32.mrf.mxu3 }
 0x29d   :  { %v653_v57 = vadd.f32 %v1128_v31, %v652_v56 }
 0x29f   :  { %v680_v60 = vmax.f32 %v653_v57, 0.0 }
 0x2a4   :  { %v654_v58 = vpop.f32.mrf.mxu3 }
 0x2a5   :  { %v655_v59 = vadd.f32 %v1128_v31, %v654_v58 }
 0x2a7   :  { %v681_v61 = vmax.f32 %v655_v59, 0.0 }
 0x2a9   :  { %v692_v62 = vpack.c.bf16 %v681_v61, %v680_v60 }
 0x2ab   :  { %794 = vmatmul.bf16.gmra.mxu0 %v692_v62 }
 0x2ac   :  { %v657_v63 = vpop.f32.mrf.mxu3 }
 0x2ad   :  { %v658_v0 = vadd.f32 %v1128_v31, %v657_v63 }
 0x2af   :  { %v682_v3 = vmax.f32 %v658_v0, 0.0 }
 0x2b4   :  { %v659_v1 = vpop.f32.mrf.mxu3 }
 0x2b5   :  { %v660_v2 = vadd.f32 %v1128_v31, %v659_v1 }
 0x2b7   :  { %v683_v4 = vmax.f32 %v660_v2, 0.0 }
 0x2b9   :  { %v693_v5 = vpack.c.bf16 %v683_v4, %v682_v3 }
 0x2bb   :  { %799 = vmatmul.bf16.gmra.mxu0 %v693_v5 }
 0x2bc   :  { %v662_v6 = vpop.f32.mrf.mxu3 }
 0x2bd   :  { %v663_v7 = vadd.f32 %v1128_v31, %v662_v6 }
 0x2bf   :  { %v684_v10 = vmax.f32 %v663_v7, 0.0 }
 0x2c4   :  { %v664_v8 = vpop.f32.mrf.mxu3 }
 0x2c5   :  { %v665_v9 = vadd.f32 %v1128_v31, %v664_v8 }
 0x2c7   :  { %v685_v11 = vmax.f32 %v665_v9, 0.0 }
 0x2c9   :  { %v694_v12 = vpack.c.bf16 %v685_v11, %v684_v10 }
 0x2cb   :  { %804 = vmatmul.bf16.gmra.mxu0 %v694_v12 }
 0x2cc   :  { %v667_v13 = vpop.f32.mrf.mxu3 }
 0x2cd   :  { %v668_v14 = vadd.f32 %v1128_v31, %v667_v13 }
 0x2cf   :  { %v686_v17 = vmax.f32 %v668_v14, 0.0 }
 0x2d4   :  { %v669_v15 = vpop.f32.mrf.mxu3 }
 0x2d5   :  { %v670_v16 = vadd.f32 %v1128_v31, %v669_v15 }
 0x2d7   :  { %v687_v18 = vmax.f32 %v670_v16, 0.0 }
 0x2d9   :  { %v695_v19 = vpack.c.bf16 %v687_v18, %v686_v17 }
 0x2db   :  { %809 = vmatmul.bf16.gmra.mxu0 %v695_v19 }
 0x2e8   :  { %v775_v21 = vpop.f32.mrf.mxu0 }
 0x2e9   :  { %v776_v22 = vadd.f32 %v1129_v20, %v775_v21 }
 0x2eb   :  { %815 = vst [vmem:[#allocation8] sm:$0xff] %v776_v22 }
 0x2f0   :  { %v777_v23 = vpop.f32.mrf.mxu0 }
 0x2f1   :  { %v778_v24 = vadd.f32 %v1129_v20, %v777_v23 }
 0x2f3   :  { %816 = vst [vmem:[#allocation8 + $0x8] sm:$0xff] %v778_v24 }
 0x2f8   :  { %v780_v26 = vpop.f32.mrf.mxu0 }
 0x2f9   :  { %v781_v28 = vadd.f32 %v1129_v20, %v780_v26 }
 0x2fb   :  { %817 = vst [vmem:[#allocation8 + $0x10] sm:$0xff] %v781_v28 }
 0x300   :  { %v782_v30 = vpop.f32.mrf.mxu0 }
 0x301   :  { %v783_v32 = vadd.f32 %v1129_v20, %v782_v30 }
 0x303   :  { %818 = vst [vmem:[#allocation8 + $0x18] sm:$0xff] %v783_v32 }
 0x308   :  { %v785_v33 = vpop.f32.mrf.mxu0 }
 0x309   :  { %v786_v34 = vadd.f32 %v1129_v20, %v785_v33 }
 0x30b   :  { %819 = vst [vmem:[#allocation8 + $0x20] sm:$0xff] %v786_v34 }
 0x310   :  { %v787_v31 = vpop.f32.mrf.mxu0 }
 0x311   :  { %v788_v25 = vadd.f32 %v1129_v20, %v787_v31 }
 0x313   :  { %820 = vst [vmem:[#allocation8 + $0x28] sm:$0xff] %v788_v25 }
 0x318   :  { %v790_v27 = vpop.f32.mrf.mxu0 }
 0x319   :  { %v791_v35 = vadd.f32 %v1129_v20, %v790_v27 }
 0x31b   :  { %821 = vst [vmem:[#allocation8 + $0x30] sm:$0xff] %v791_v35 }
 0x320   :  { %v792_v36 = vpop.f32.mrf.mxu0 }
 0x321   :  { %v793_v37 = vadd.f32 %v1129_v20, %v792_v36 }
 0x323   :  { %822 = vst [vmem:[#allocation8 + $0x38] sm:$0xff] %v793_v37 }
 0x328   :  { %v795_v38 = vpop.f32.mrf.mxu0 }
 0x329   :  { %v796_v29 = vadd.f32 %v1129_v20, %v795_v38 }
 0x32b   :  { %823 = vst [vmem:[#allocation8 + $0x40] sm:$0xff] %v796_v29 }
 0x330   :  { %v797_v39 = vpop.f32.mrf.mxu0 }
 0x331   :  { %v798_v40 = vadd.f32 %v1129_v20, %v797_v39 }
 0x333   :  { %824 = vst [vmem:[#allocation8 + $0x48] sm:$0xff] %v798_v40 }
 0x338   :  { %v800_v41 = vpop.f32.mrf.mxu0 }
 0x339   :  { %v801_v42 = vadd.f32 %v1129_v20, %v800_v41 }
 0x33b   :  { %825 = vst [vmem:[#allocation8 + $0x50] sm:$0xff] %v801_v42 }
 0x340   :  { %v802_v43 = vpop.f32.mrf.mxu0 }
 0x341   :  { %v803_v44 = vadd.f32 %v1129_v20, %v802_v43 }
 0x343   :  { %826 = vst [vmem:[#allocation8 + $0x58] sm:$0xff] %v803_v44 }
 0x348   :  { %v805_v45 = vpop.f32.mrf.mxu0 }
 0x349   :  { %v806_v46 = vadd.f32 %v1129_v20, %v805_v45 }
 0x34b   :  { %827 = vst [vmem:[#allocation8 + $0x60] sm:$0xff] %v806_v46 }
 0x350   :  { %v807_v47 = vpop.f32.mrf.mxu0 }
 0x351   :  { %v808_v48 = vadd.f32 %v1129_v20, %v807_v47 }
 0x353   :  { %828 = vst [vmem:[#allocation8 + $0x68] sm:$0xff] %v808_v48 }
 0x358   :  { %v810_v49 = vpop.f32.mrf.mxu0 }
 0x359   :  { %v811_v50 = vadd.f32 %v1129_v20, %v810_v49 }
 0x35b   :  { %829 = vst [vmem:[#allocation8 + $0x70] sm:$0xff] %v811_v50 }
 0x360   :  { %v812_v51 = vpop.f32.mrf.mxu0 }
 0x361   :  { %v813_v52 = vadd.f32 %v1129_v20, %v812_v51 }
 0x363   :  { %830 = vst [vmem:[#allocation8 + $0x78] sm:$0xff] %v813_v52 }
 0x364   :  { %843 = dma.vmem_to_hbm [thread:$0]  %s836_s2, 2048, %s838_s5, [#allocation4], %s1240_s6, %s1240_s6, %s1241_s7  }
 0x365   :  { %1230 = dma.done.wait [#allocation4], 2048  }
 0x366   :  { %1231 = vsyncadd [#allocation4], 4294965248 }
 0x367   :  { %848 = vsyncpa [#allocation3], 1 }
 0x368   :  { %849 = vsyncpa [#allocation6], 1 }
 0x369   :  { %850 = vsyncpa [#allocation4], 1 }

</bundles_post_ra>
